<compile_context>
chip_gen: v6e
topology: v6e:2x2x1
jax: 0.10.0
libtpu: 0.0.40
codegen_flags: <defaults>
</compile_context>

<pallas_src>
import functools

import jax
import jax.numpy as jnp
from jax.experimental import pallas as pl
from jax.experimental.pallas import tpu as pltpu

_LANE = 128
_SUBLANE = 8


def _round_up(x, m):
    return (x + m - 1) // m * m


def _vmem_limit_bytes(footprint_bytes):
    """Raise the scoped-VMEM limit only when needed; never near v7x's 64 MiB."""
    request = int(footprint_bytes * 1.5) + (2 << 20)
    if request <= (32 << 20):        # default scoped limit already suffices
        return None
    return min(request, 48 << 20)


def _pad2d(a, rows, cols, dtype):
    return jnp.zeros((rows, cols), dtype).at[:a.shape[0], :a.shape[1]].set(
        a.astype(dtype))


# ---------------------------------------------------------------------------
# One-time parameter preparation (hoisted out of the per-step path).
# ---------------------------------------------------------------------------
def prepare_params(params, compute_dtype=jnp.float32):
    whh, bhh, whx, bhx, wxh, bxh = params
    H, I, O = whh.shape[0], whx.shape[0], wxh.shape[1]
    Hp, Ip, Op = (_round_up(d, _LANE) for d in (H, I, O))
    cd = jnp.dtype(compute_dtype)

    whh_p = jnp.zeros((Hp, Hp), cd).at[:H, :H].set(whh.astype(cd))
    whx_p = jnp.zeros((Ip, Hp), cd).at[:I, :H].set(whx.astype(cd))
    # Folded input bias (bhh + bhx), kept f32 (f32 accumulation; v5e has no
    # bf16 VPU/EUP path).
    b_in = jnp.zeros((1, Hp), jnp.float32).at[:, :H].set(
        (bhh + bhx).astype(jnp.float32).reshape(1, H))
    wxh_p = jnp.zeros((Hp, Op), cd).at[:H, :O].set(wxh.astype(cd))
    b_out = jnp.zeros((1, Op), jnp.float32).at[:, :O].set(
        bxh.astype(jnp.float32).reshape(1, O))

    return {"arrays": (whh_p, whx_p, b_in, wxh_p, b_out),
            "dims": (H, I, O), "pdims": (Hp, Ip, Op), "compute_dtype": cd}


# ---------------------------------------------------------------------------
# Kernels
# ---------------------------------------------------------------------------
def _rnn_cell_kernel(h_ref, x_ref, whh_ref, whx_ref, b_in_ref,
                     w_out_ref, b_out_ref, ht_ref, yt_ref):
    """Single-step fused cell: two MXU GEMMs -> f32 acc -> EUP tanh -> GEMM."""
    pre = (jnp.dot(h_ref[...], whh_ref[...], preferred_element_type=jnp.float32)
           + jnp.dot(x_ref[...], whx_ref[...], preferred_element_type=jnp.float32)
           + b_in_ref[...])
    ht_ref[...] = jnp.tanh(pre).astype(ht_ref.dtype)
    # PyTorch feeds the *stored* hidden state into the output Linear.
    ht = ht_ref[...]
    yt = (jnp.dot(ht.astype(w_out_ref.dtype), w_out_ref[...],
                  preferred_element_type=jnp.float32) + b_out_ref[...])
    yt_ref[...] = yt.astype(yt_ref.dtype)


def _rnn_seq_kernel(h0_ref, x_ref, whh_ref, whx_ref, b_in_ref,
                    w_out_ref, b_out_ref, hT_ref, y_ref, h_carry):
    """Sequence cell over grid=(T,): weights VMEM-resident, h carried in VMEM."""
    t = pl.program_id(0)

    @pl.when(t == 0)
    def _():
        h_carry[...] = h0_ref[...].astype(h_carry.dtype)

    pre = (jnp.dot(h_carry[...].astype(whh_ref.dtype), whh_ref[...],
                   preferred_element_type=jnp.float32)
           + jnp.dot(x_ref[...], whx_ref[...],
                     preferred_element_type=jnp.float32)
           + b_in_ref[...])
    # Carry what PyTorch would store (module dtype) so the recurrence matches.
    h_carry[...] = jnp.tanh(pre).astype(h_carry.dtype)
    yt = (jnp.dot(h_carry[...].astype(w_out_ref.dtype), w_out_ref[...],
                  preferred_element_type=jnp.float32) + b_out_ref[...])
    y_ref[...] = yt.astype(y_ref.dtype)
    hT_ref[...] = h_carry[...].astype(hT_ref.dtype)


# ---------------------------------------------------------------------------
# Single-step forward (matches the PyTorch module's forward signature)
# ---------------------------------------------------------------------------
@functools.partial(jax.jit, static_argnames=("dims", "pdims", "cd"))
def _rnn_cell_step(ht_1, xt, arrays, dims, pdims, cd):
    whh_p, whx_p, b_in, wxh_p, b_out = arrays
    H, I, O = dims
    Hp, Ip, Op = pdims
    B = ht_1.shape[0]
    out_dtype = ht_1.dtype

    sub = _SUBLANE * (2 if cd == jnp.dtype(jnp.bfloat16) else 1)
    Bp = _round_up(B, sub)

    # Per-step activation padding only (weights were padded once).
    h_p = _pad2d(ht_1, Bp, Hp, cd)
    x_p = _pad2d(xt, Bp, Ip, cd)

    itm_cd = cd.itemsize
    itm_out = jnp.dtype(out_dtype).itemsize
    w_bytes = (Hp * Hp + Ip * Hp + Hp * Op) * itm_cd + (Hp + Op) * 4
    act_bytes = (Bp * Hp + Bp * Ip) * itm_cd + (Bp * Hp + Bp * Op) * itm_out
    cost = pl.CostEstimate(
        flops=2 * Bp * (Hp * Hp + Ip * Hp + Hp * Op),
        transcendentals=Bp * Hp,
        bytes_accessed=w_bytes + act_bytes)

    vmem = pl.BlockSpec(memory_space=pltpu.MemorySpace.VMEM)
    ht_p, yt_p = pl.pallas_call(
        _rnn_cell_kernel,
        out_shape=(jax.ShapeDtypeStruct((Bp, Hp), out_dtype),
                   jax.ShapeDtypeStruct((Bp, Op), out_dtype)),
        in_specs=[vmem] * 7,
        out_specs=(vmem, vmem),
        cost_estimate=cost,
        compiler_params=pltpu.CompilerParams(
            vmem_limit_bytes=_vmem_limit_bytes(w_bytes + act_bytes)),
    )(h_p, x_p, whh_p, whx_p, b_in, wxh_p, b_out)

    return ht_p[:B, :H], yt_p[:B, :O]


def rnn_cell_forward(ht_1, xt, prepared):
    return _rnn_cell_step(ht_1, xt, prepared["arrays"], prepared["dims"],
                          prepared["pdims"], prepared["compute_dtype"])


# ---------------------------------------------------------------------------
# Sequence forward: one pallas_call over grid=(T,) (the big structural win)
# ---------------------------------------------------------------------------
@functools.partial(jax.jit, static_argnames=("dims", "pdims", "cd"))
def _rnn_seq(h0, xs, arrays, dims, pdims, cd):
    whh_p, whx_p, b_in, wxh_p, b_out = arrays
    H, I, O = dims
    Hp, Ip, Op = pdims
    T, B, _ = xs.shape
    out_dtype = h0.dtype

    sub = _SUBLANE * (2 if cd == jnp.dtype(jnp.bfloat16) else 1)
    Bp = _round_up(B, sub)

    h0_p = _pad2d(h0, Bp, Hp, cd)
    xs_p = jnp.zeros((T, Bp, Ip), cd).at[:, :B, :I].set(xs.astype(cd))

    itm_cd = cd.itemsize
    itm_out = jnp.dtype(out_dtype).itemsize
    w_bytes = (Hp * Hp + Ip * Hp + Hp * Op) * itm_cd + (Hp + Op) * 4
    stream_bytes = (T * Bp * Ip) * itm_cd + (T * Bp * Op) * itm_out \
        + (Bp * Hp) * (itm_cd + itm_out)
    cost = pl.CostEstimate(
        flops=2 * T * Bp * (Hp * Hp + Ip * Hp + Hp * Op),
        transcendentals=T * Bp * Hp,
        bytes_accessed=w_bytes + stream_bytes)

    # VMEM footprint: resident weights/biases/h0/hT + double-buffered x/y
    # stream blocks + the h carry scratch.
    footprint = (w_bytes
                 + Bp * Hp * itm_cd            # h0 (resident)
                 + 2 * Bp * Ip * itm_cd        # x_t double-buffered
                 + 2 * Bp * Op * itm_out       # y_t double-buffered
                 + 2 * Bp * Hp * itm_out)      # hT output + h carry scratch

    const2 = lambda t: (0, 0)
    grid_spec = pltpu.PrefetchScalarGridSpec(
        num_scalar_prefetch=0,
        grid=(T,),
        in_specs=[
            pl.BlockSpec((Bp, Hp), const2),                     # h0 (DMA once)
            pl.BlockSpec((None, Bp, Ip), lambda t: (t, 0, 0)),  # x_t streamed
            pl.BlockSpec((Hp, Hp), const2),                     # Whh resident
            pl.BlockSpec((Ip, Hp), const2),                     # Whx resident
            pl.BlockSpec((1, Hp), const2),                      # b_in resident
            pl.BlockSpec((Hp, Op), const2),                     # Wxh resident
            pl.BlockSpec((1, Op), const2),                      # b_out resident
        ],
        out_specs=(
            pl.BlockSpec((Bp, Hp), const2),                     # final hidden
            pl.BlockSpec((None, Bp, Op), lambda t: (t, 0, 0)),  # y_t streamed
        ),
        scratch_shapes=[pltpu.VMEM((Bp, Hp), out_dtype)],       # h carry
    )

    hT_p, ys_p = pl.pallas_call(
        _rnn_seq_kernel,
        out_shape=(jax.ShapeDtypeStruct((Bp, Hp), out_dtype),
                   jax.ShapeDtypeStruct((T, Bp, Op), out_dtype)),
        grid_spec=grid_spec,
        cost_estimate=cost,
        compiler_params=pltpu.CompilerParams(
            # The recurrence axis must stay "arbitrary".  (Adding a second,
            # "parallel" grid axis tiling Hp/Op to use both v7x TensorCores
            # only pays off for large hidden sizes; not needed at these shapes.)
            dimension_semantics=("arbitrary",),
            vmem_limit_bytes=_vmem_limit_bytes(footprint)),
    )(h0_p, xs_p, whh_p, whx_p, b_in, wxh_p, b_out)

    return hT_p[:B, :H], ys_p[:, :B, :O]


def rnn_sequence_forward(h0, xs, prepared):
    """Run the cell over xs[t], t=0..T-1, in ONE pallas_call (grid=(T,))."""
    return _rnn_seq(h0, xs, prepared["arrays"], prepared["dims"],
                    prepared["pdims"], prepared["compute_dtype"])


# ---------------------------------------------------------------------------
# Parameters + pure-JAX reference
# ---------------------------------------------------------------------------
def make_params(key, h_dim, inp_x_dim, out_x_dim, dtype=jnp.float32):
    """Deterministic synthetic parameters matching nn.Linear shapes.

    PyTorch nn.Linear(in, out) stores weight (out, in); we keep the math
    identical but store the transposed (in, out) layout for `x @ W`.
    """
    ks = jax.random.split(key, 6)
    whh = jax.random.normal(ks[0], (h_dim, h_dim), dtype) * 0.1       # hh_dense
    bhh = jax.random.normal(ks[1], (1, h_dim), dtype) * 0.1
    whx = jax.random.normal(ks[2], (inp_x_dim, h_dim), dtype) * 0.1   # hx_dense
    bhx = jax.random.normal(ks[3], (1, h_dim), dtype) * 0.1
    wxh = jax.random.normal(ks[4], (h_dim, out_x_dim), dtype) * 0.1   # xh_dense
    bxh = jax.random.normal(ks[5], (1, out_x_dim), dtype) * 0.1
    return whh, bhh, whx, bhx, wxh, bxh


def rnn_cell_reference(ht_1, xt, params):
    """Pure-JAX reference of the PyTorch forward, for correctness checking."""
    whh, bhh, whx, bhx, wxh, bxh = params
    ht = jnp.tanh(ht_1 @ whh + bhh + xt @ whx + bhx)
    yt = ht @ wxh + bxh
    return ht, yt


if __name__ == "__main__":
    batch = 2
    h_dim = 32
    inp_x_dim = 16
    out_x_dim = 24
    seq_len = 8

    key = jax.random.PRNGKey(0)
    k_h, k_x, k_seq, k_p = jax.random.split(key, 4)

    ht_1 = jax.random.normal(k_h, (batch, h_dim), jnp.float32)
    xt = jax.random.normal(k_x, (batch, inp_x_dim), jnp.float32)
    xs = jax.random.normal(k_seq, (seq_len, batch, inp_x_dim), jnp.float32)
    params = make_params(k_p, h_dim, inp_x_dim, out_x_dim)

    # --- one-time weight padding (hoisted out of the per-step path) ---
    prepared = prepare_params(params)

    # --- single step, f32 ---
    ht, yt = rnn_cell_forward(ht_1, xt, prepared)
    jax.block_until_ready((ht, yt))
    ht_ref, yt_ref = rnn_cell_reference(ht_1, xt, params)
    assert ht.shape == (batch, h_dim) and yt.shape == (batch, out_x_dim)
    assert jnp.allclose(ht, ht_ref, atol=1e-5, rtol=1e-5)
    assert jnp.allclose(yt, yt_ref, atol=1e-5, rtol=1e-5)

    # --- sequence, f32: one grid=(T,) kernel, weights VMEM-resident ---
    hT, ys = rnn_sequence_forward(ht_1, xs, prepared)
    jax.block_until_ready((hT, ys))
    h_ref = ht_1
    ys_ref = []
    for t in range(seq_len):
        h_ref, y_t_ref = rnn_cell_reference(h_ref, xs[t], params)
        ys_ref.append(y_t_ref)
    ys_ref = jnp.stack(ys_ref)
    assert hT.shape == (batch, h_dim) and ys.shape == (seq_len, batch, out_x_dim)
    assert jnp.allclose(hT, h_ref, atol=1e-4, rtol=1e-4)
    assert jnp.allclose(ys, ys_ref, atol=1e-4, rtol=1e-4)

    # --- single step, bf16 compute (f32 accumulation), looser tolerance ---
    prepared_bf16 = prepare_params(params, compute_dtype=jnp.bfloat16)
    ht_b, yt_b = rnn_cell_forward(ht_1, xt, prepared_bf16)
    jax.block_until_ready((ht_b, yt_b))
    assert jnp.allclose(ht_b, ht_ref, atol=5e-2, rtol=5e-2)
    assert jnp.allclose(yt_b, yt_ref, atol=5e-2, rtol=5e-2)

    print("KERNEL_OK")
</pallas_src>

<mosaic_0001>
module attributes {stable_mosaic.version = 11 : i64} {
  func.func @_rnn_cell_kernel(%arg0: memref<8x128xf32, #tpu.memory_space<vmem>>, %arg1: memref<8x128xf32, #tpu.memory_space<vmem>>, %arg2: memref<128x128xf32, #tpu.memory_space<vmem>>, %arg3: memref<128x128xf32, #tpu.memory_space<vmem>>, %arg4: memref<1x128xf32, #tpu.memory_space<vmem>>, %arg5: memref<128x128xf32, #tpu.memory_space<vmem>>, %arg6: memref<1x128xf32, #tpu.memory_space<vmem>>, %arg7: memref<8x128xf32, #tpu.memory_space<vmem>>, %arg8: memref<8x128xf32, #tpu.memory_space<vmem>>) attributes {dimension_semantics = [], scalar_prefetch = 0 : i64, scratch_operands = 0 : i64, tpu.core_type = #tpu.core_type<tc>} {
    %c0 = arith.constant 0 : index
    %c0_0 = arith.constant 0 : index
    %0 = vector.load %arg0[%c0, %c0_0] : memref<8x128xf32, #tpu.memory_space<vmem>>, vector<8x128xf32>
    %c0_1 = arith.constant 0 : index
    %c0_2 = arith.constant 0 : index
    %1 = vector.load %arg2[%c0_1, %c0_2] : memref<128x128xf32, #tpu.memory_space<vmem>>, vector<128x128xf32>
    %cst = arith.constant dense<0.000000e+00> : vector<8x128xf32>
    %2 = tpu.matmul %0, %1, %cst {dimension_numbers = #tpu.dot_dimension_numbers<[1], [0], [0], [1], [0, 0, 1, 1], [], []>} : vector<8x128xf32>, vector<128x128xf32>, vector<8x128xf32> -> vector<8x128xf32>
    %c0_3 = arith.constant 0 : index
    %c0_4 = arith.constant 0 : index
    %3 = vector.load %arg1[%c0_3, %c0_4] : memref<8x128xf32, #tpu.memory_space<vmem>>, vector<8x128xf32>
    %c0_5 = arith.constant 0 : index
    %c0_6 = arith.constant 0 : index
    %4 = vector.load %arg3[%c0_5, %c0_6] : memref<128x128xf32, #tpu.memory_space<vmem>>, vector<128x128xf32>
    %cst_7 = arith.constant dense<0.000000e+00> : vector<8x128xf32>
    %5 = tpu.matmul %3, %4, %cst_7 {dimension_numbers = #tpu.dot_dimension_numbers<[1], [0], [0], [1], [0, 0, 1, 1], [], []>} : vector<8x128xf32>, vector<128x128xf32>, vector<8x128xf32> -> vector<8x128xf32>
    %6 = arith.addf %2, %5 : vector<8x128xf32>
    %c0_8 = arith.constant 0 : index
    %c0_9 = arith.constant 0 : index
    %7 = vector.load %arg4[%c0_8, %c0_9] : memref<1x128xf32, #tpu.memory_space<vmem>>, vector<1x128xf32>
    %8 = vector.broadcast %7 : vector<1x128xf32> to vector<8x128xf32>
    %9 = arith.addf %6, %8 : vector<8x128xf32>
    %10 = math.tanh %9 : vector<8x128xf32>
    %c0_10 = arith.constant 0 : index
    %c0_11 = arith.constant 0 : index
    %11 = vector.load %arg7[%c0_10, %c0_11] : memref<8x128xf32, #tpu.memory_space<vmem>>, vector<8x128xf32>
    tpu.vector_store %arg7[%c0_10, %c0_11], %10 {strides = array<i32>} : memref<8x128xf32, #tpu.memory_space<vmem>>, vector<8x128xf32>,
    %c0_12 = arith.constant 0 : index
    %c0_13 = arith.constant 0 : index
    %12 = vector.load %arg7[%c0_12, %c0_13] : memref<8x128xf32, #tpu.memory_space<vmem>>, vector<8x128xf32>
    %c0_14 = arith.constant 0 : index
    %c0_15 = arith.constant 0 : index
    %13 = vector.load %arg5[%c0_14, %c0_15] : memref<128x128xf32, #tpu.memory_space<vmem>>, vector<128x128xf32>
    %cst_16 = arith.constant dense<0.000000e+00> : vector<8x128xf32>
    %14 = tpu.matmul %12, %13, %cst_16 {dimension_numbers = #tpu.dot_dimension_numbers<[1], [0], [0], [1], [0, 0, 1, 1], [], []>} : vector<8x128xf32>, vector<128x128xf32>, vector<8x128xf32> -> vector<8x128xf32>
    %c0_17 = arith.constant 0 : index
    %c0_18 = arith.constant 0 : index
    %15 = vector.load %arg6[%c0_17, %c0_18] : memref<1x128xf32, #tpu.memory_space<vmem>>, vector<1x128xf32>
    %16 = vector.broadcast %15 : vector<1x128xf32> to vector<8x128xf32>
    %17 = arith.addf %14, %16 : vector<8x128xf32>
    %c0_19 = arith.constant 0 : index
    %c0_20 = arith.constant 0 : index
    %18 = vector.load %arg8[%c0_19, %c0_20] : memref<8x128xf32, #tpu.memory_space<vmem>>, vector<8x128xf32>
    tpu.vector_store %arg8[%c0_19, %c0_20], %17 {strides = array<i32>} : memref<8x128xf32, #tpu.memory_space<vmem>>, vector<8x128xf32>,
    return
  }
}

</mosaic_0001>

<bundles_post_ra>
// kernel: _rnn_cell_step.1
= control target key start
LH: loop header
LB: loop body
LE: loop exit
PB: predicated region body
PF: predicated region fallthrough
CT: control target
= control target key end

     0   :  { %14 = vsyncpa [#allocation3], 0  ;;  %s722_s0 = inlined_call_operand.vmem [shape: f32[8,128], index: 0, kind: input, shape index: {}]   ;;  %s723_s1 = inlined_call_operand.vmem [shape: f32[8,128], index: 1, kind: input, shape index: {}]   ;;  %s724_s2 = inlined_call_operand.hbm [shape: f32[128,128], index: 2, kind: input, shape index: {}]   ;;  %s725_s3 = inlined_call_operand.hbm [shape: f32[128,128], index: 3, kind: input, shape index: {}]   ;;  %s726_s4 = inlined_call_operand.vmem [shape: f32[1,128], index: 4, kind: input, shape index: {}]   ;;  %s727_s5 = inlined_call_operand.hbm [shape: f32[128,128], index: 5, kind: input, shape index: {}]   ;;  %s728_s6 = inlined_call_operand.vmem [shape: f32[1,128], index: 6, kind: input, shape index: {}]   ;;  %s729_s7 = inlined_call_operand.vmem [shape: f32[8,128], index: 7, kind: output, shape index: {0}]   ;;  %s730_s8 = inlined_call_operand.vmem [shape: f32[8,128], index: 8, kind: output, shape index: {1}]  }
   0x1   :  { %15 = vsyncpa [#allocation5], 0  ;;  %s589_s27 = smov [#allocation4]   ;;  %s590_s29 = smov [#allocation2]  }
   0x2   :  { %s37_s28 = sshll.u32 %s589_s27, 4  ;;  %s25_s30 = sshll.u32 %s590_s29, 4  ;;  %s38_s28 = int_to_ptr.vmem [resolvable:$true] %s37_s28  ;;  %s26_s30 = int_to_ptr.vmem [resolvable:$true] %s25_s30 }
   0x3   :  { %s533_s9 = scalar_lea.vmem %s38_s28, 2048  ;;  %p538_p1 = scmp.lt.s32.totalorder %s38_s28, %s38_s28 }
   0x4   :  { %p534_p0 = scmp.ne.s32.totalorder %s38_s28, %s533_s9  ;;  %p539_p2 = scmp.lt.s32.totalorder %s533_s9, %s533_s9 }
   0x6   :  { %p540_p3 = por %p539_p2, %p538_p1 }
   0x8   :  { %p541_p4 = pnand %p540_p3, %p534_p0 }
   0xa   :  { %544 = shalt.err (!%p541_p4)
}
   0xb   :  { %s591_s10 = smov 128   ;;  %s592_s11 = smov 8  }
   0xc   :  { %43 = dma.hbm_to_vmem [thread:$0]  %s725_s3, 2048, %s38_s28, [#allocation5], %s591_s10, %s591_s10, %s592_s11  }
   0xd   :  { %s553_s14 = scalar_lea.vmem %s26_s30, 2048  ;;  %p558_p6 = scmp.lt.s32.totalorder %s26_s30, %s26_s30 }
   0xe   :  { %p554_p5 = scmp.ne.s32.totalorder %s26_s30, %s553_s14  ;;  %p559_p7 = scmp.lt.s32.totalorder %s553_s14, %s553_s14 }
  0x10   :  { %p560_p8 = por %p559_p7, %p558_p6 }
  0x12   :  { %p561_p9 = pnand %p560_p8, %p554_p5 }
  0x14   :  { %564 = shalt.err (!%p561_p9)
}
  0x15   :  { %31 = dma.hbm_to_vmem [thread:$0]  %s724_s2, 2048, %s26_s30, [#allocation3], %s591_s10, %s591_s10, %s592_s11  }
  0x16   :  { %s593_s17 = smov [#allocation6]  }
  0x17   :  { %s51_s18 = sshll.u32 %s593_s17, 4  ;;  %s52_s18 = int_to_ptr.vmem [resolvable:$true] %s51_s18 }
  0x18   :  { %s573_s19 = scalar_lea.vmem %s52_s18, 2048  ;;  %p578_p11 = scmp.lt.s32.totalorder %s52_s18, %s52_s18 }
  0x19   :  { %p574_p10 = scmp.ne.s32.totalorder %s52_s18, %s573_s19  ;;  %p579_p12 = scmp.lt.s32.totalorder %s573_s19, %s573_s19 }
  0x1b   :  { %p580_p13 = por %p579_p12, %p578_p11 }
  0x1d   :  { %p581_p0 = pnand %p580_p13, %p574_p10 }
  0x1f   :  { %584 = shalt.err (!%p581_p0)
}
  0x20   :  { %57 = dma.hbm_to_vmem [thread:$0]  %s727_s5, 2048, %s52_s18, [#allocation5], %s591_s10, %s591_s10, %s592_s11  }
  0x21   :  { %585 = dma.done.wait [#allocation3], 2048  }
  0x22   :  { %586 = vsyncadd [#allocation3], 4294965248 }
  0x23   :  { %587 = dma.done.wait [#allocation5], 4096  }
  0x24   :  { %588 = vsyncadd [#allocation5], 4294963200  ;;  %v594_v0 = vmov 0.0   ;;  %vm595_vm0 = vmmov 0   ;;  %v102_v1 = vld [vmem:[#allocation4 + $0x78] sm:$0xff]  ;;  %v101_v3 = vld [vmem:[#allocation4 + $0x70] sm:$0xff] }
  0x25   :  { %411 = vmatprep.subr.mxu0 %v594_v0  ;;  %446 = vmatprep.subr.mxu1 %v594_v0  ;;  %v85_v2 = vld [vmem:[#allocation2 + $0x78] sm:$0xff]  ;;  %v84_v4 = vld [vmem:[#allocation2 + $0x70] sm:$0xff]  ;;  %v100_v5 = vld [vmem:[#allocation4 + $0x68] sm:$0xff] }
  0x26   :  { %443 = vmatprep.mubr.msk.f32.mxu0 %vm595_vm0, %v594_v0  ;;  %478 = vmatprep.mubr.msk.f32.mxu1 %vm595_vm0, %v594_v0  ;;  %v83_v6 = vld [vmem:[#allocation2 + $0x68] sm:$0xff]  ;;  %v99_v7 = vld [vmem:[#allocation4 + $0x60] sm:$0xff]  ;;  %v98_v9 = vld [vmem:[#allocation4 + $0x58] sm:$0xff] }
  0x27   :  { %412 = vmatpush3.msra.mxu0 %v102_v1  ;;  %447 = vmatpush3.msra.mxu1 %v85_v2  ;;  %v82_v8 = vld [vmem:[#allocation2 + $0x60] sm:$0xff]  ;;  %v81_v10 = vld [vmem:[#allocation2 + $0x58] sm:$0xff]  ;;  %v97_v11 = vld [vmem:[#allocation4 + $0x50] sm:$0xff] }
  0x28   :  { %413 = vmatprep.subr.mxu0 %v594_v0  ;;  %448 = vmatprep.subr.mxu1 %v594_v0  ;;  %v80_v12 = vld [vmem:[#allocation2 + $0x50] sm:$0xff]  ;;  %v96_v13 = vld [vmem:[#allocation4 + $0x48] sm:$0xff]  ;;  %v95_v15 = vld [vmem:[#allocation4 + $0x40] sm:$0xff] }
  0x29   :  { %414 = vmatpush3.msra.mxu0 %v101_v3  ;;  %449 = vmatpush3.msra.mxu1 %v84_v4  ;;  %v79_v14 = vld [vmem:[#allocation2 + $0x48] sm:$0xff]  ;;  %v78_v16 = vld [vmem:[#allocation2 + $0x40] sm:$0xff]  ;;  %v94_v17 = vld [vmem:[#allocation4 + $0x38] sm:$0xff] }
  0x2a   :  { %415 = vmatprep.subr.mxu0 %v594_v0  ;;  %450 = vmatprep.subr.mxu1 %v594_v0  ;;  %v77_v18 = vld [vmem:[#allocation2 + $0x38] sm:$0xff]  ;;  %v93_v19 = vld [vmem:[#allocation4 + $0x30] sm:$0xff]  ;;  %v92_v21 = vld [vmem:[#allocation4 + $0x28] sm:$0xff] }
  0x2b   :  { %416 = vmatpush3.msra.mxu0 %v100_v5  ;;  %451 = vmatpush3.msra.mxu1 %v83_v6  ;;  %v76_v20 = vld [vmem:[#allocation2 + $0x30] sm:$0xff]  ;;  %v75_v22 = vld [vmem:[#allocation2 + $0x28] sm:$0xff]  ;;  %v91_v23 = vld [vmem:[#allocation4 + $0x20] sm:$0xff] }
  0x2c   :  { %417 = vmatprep.subr.mxu0 %v594_v0  ;;  %452 = vmatprep.subr.mxu1 %v594_v0  ;;  %v74_v24 = vld [vmem:[#allocation2 + $0x20] sm:$0xff]  ;;  %v90_v25 = vld [vmem:[#allocation4 + $0x18] sm:$0xff]  ;;  %v89_v27 = vld [vmem:[#allocation4 + $0x10] sm:$0xff] }
  0x2d   :  { %418 = vmatpush3.msra.mxu0 %v99_v7  ;;  %453 = vmatpush3.msra.mxu1 %v82_v8  ;;  %v73_v26 = vld [vmem:[#allocation2 + $0x18] sm:$0xff]  ;;  %v72_v28 = vld [vmem:[#allocation2 + $0x10] sm:$0xff]  ;;  %v88_v29 = vld [vmem:[#allocation4 + $0x8] sm:$0xff] }
  0x2e   :  { %419 = vmatprep.subr.mxu0 %v594_v0  ;;  %454 = vmatprep.subr.mxu1 %v594_v0  ;;  %v71_v30 = vld [vmem:[#allocation2 + $0x8] sm:$0xff]  ;;  %v87_v31 = vld [vmem:[#allocation4] sm:$0xff]  ;;  %v269_v35 = vld [vmem:[#allocation6 + $0x78] sm:$0xff] }
  0x2f   :  { %420 = vmatpush3.msra.mxu0 %v98_v9  ;;  %455 = vmatpush3.msra.mxu1 %v81_v10  ;;  %v70_v32 = vld [vmem:[#allocation2] sm:$0xff]  ;;  %v268_v36 = vld [vmem:[#allocation6 + $0x70] sm:$0xff]  ;;  %v267_v37 = vld [vmem:[#allocation6 + $0x68] sm:$0xff] }
  0x30   :  { %421 = vmatprep.subr.mxu0 %v594_v0  ;;  %456 = vmatprep.subr.mxu1 %v594_v0  ;;  %v86_v33 = vld [vmem:[%s723_s1] sm:$0xff]  ;;  %v265_v39 = vld [vmem:[#allocation6 + $0x58] sm:$0xff]  ;;  %v264_v40 = vld [vmem:[#allocation6 + $0x50] sm:$0xff] }
  0x31   :  { %422 = vmatpush3.msra.mxu0 %v97_v11  ;;  %457 = vmatpush3.msra.mxu1 %v80_v12  ;;  %v69_v34 = vld [vmem:[%s722_s0] sm:$0xff]  ;;  %v263_v41 = vld [vmem:[#allocation6 + $0x48] sm:$0xff]  ;;  %v261_v43 = vld [vmem:[#allocation6 + $0x38] sm:$0xff] }
  0x32   :  { %423 = vmatprep.subr.mxu0 %v594_v0  ;;  %458 = vmatprep.subr.mxu1 %v594_v0  ;;  %v266_v38 = vld [vmem:[#allocation6 + $0x60] sm:$0xff]  ;;  %v260_v44 = vld [vmem:[#allocation6 + $0x30] sm:$0xff]  ;;  %v259_v45 = vld [vmem:[#allocation6 + $0x28] sm:$0xff] }
  0x33   :  { %424 = vmatpush3.msra.mxu0 %v96_v13  ;;  %459 = vmatpush3.msra.mxu1 %v79_v14  ;;  %v262_v42 = vld [vmem:[#allocation6 + $0x40] sm:$0xff]  ;;  %v257_v47 = vld [vmem:[#allocation6 + $0x18] sm:$0xff]  ;;  %v256_v48 = vld [vmem:[#allocation6 + $0x10] sm:$0xff] }
  0x34   :  { %425 = vmatprep.subr.mxu0 %v594_v0  ;;  %460 = vmatprep.subr.mxu1 %v594_v0  ;;  %v258_v46 = vld [vmem:[#allocation6 + $0x20] sm:$0xff]  ;;  %v255_v49 = vld [vmem:[#allocation6 + $0x8] sm:$0xff] }
  0x35   :  { %426 = vmatpush3.msra.mxu0 %v95_v15  ;;  %461 = vmatpush3.msra.mxu1 %v78_v16  ;;  %v254_v50 = vld [vmem:[#allocation6] sm:$0xff] }
  0x36   :  { %427 = vmatprep.subr.mxu0 %v594_v0  ;;  %462 = vmatprep.subr.mxu1 %v594_v0  ;;  %v358_v53 = vld [vmem:[%s726_s4] ss:$0 sm:$0xff] }
  0x37   :  { %428 = vmatpush3.msra.mxu0 %v94_v17  ;;  %463 = vmatpush3.msra.mxu1 %v77_v18  ;;  %v359_v59 = vld [vmem:[%s728_s6] ss:$0 sm:$0xff] }
  0x38   :  { %429 = vmatprep.subr.mxu0 %v594_v0  ;;  %464 = vmatprep.subr.mxu1 %v594_v0 }
  0x39   :  { %430 = vmatpush3.msra.mxu0 %v93_v19  ;;  %465 = vmatpush3.msra.mxu1 %v76_v20 }
  0x3a   :  { %431 = vmatprep.subr.mxu0 %v594_v0  ;;  %466 = vmatprep.subr.mxu1 %v594_v0 }
  0x3b   :  { %432 = vmatpush3.msra.mxu0 %v92_v21  ;;  %467 = vmatpush3.msra.mxu1 %v75_v22 }
  0x3c   :  { %433 = vmatprep.subr.mxu0 %v594_v0  ;;  %468 = vmatprep.subr.mxu1 %v594_v0 }
  0x3d   :  { %434 = vmatpush3.msra.mxu0 %v91_v23  ;;  %469 = vmatpush3.msra.mxu1 %v74_v24 }
  0x3e   :  { %435 = vmatprep.subr.mxu0 %v594_v0  ;;  %470 = vmatprep.subr.mxu1 %v594_v0 }
  0x3f   :  { %436 = vmatpush3.msra.mxu0 %v90_v25  ;;  %471 = vmatpush3.msra.mxu1 %v73_v26 }
  0x40   :  { %437 = vmatprep.subr.mxu0 %v594_v0  ;;  %472 = vmatprep.subr.mxu1 %v594_v0 }
  0x41   :  { %438 = vmatpush3.msra.mxu0 %v89_v27  ;;  %473 = vmatpush3.msra.mxu1 %v72_v28 }
  0x42   :  { %439 = vmatprep.subr.mxu0 %v594_v0  ;;  %474 = vmatprep.subr.mxu1 %v594_v0 }
  0x43   :  { %440 = vmatpush3.msra.mxu0 %v88_v29  ;;  %475 = vmatpush3.msra.mxu1 %v71_v30 }
  0x44   :  { %441 = vmatprep.subr.mxu0 %v594_v0  ;;  %476 = vmatprep.subr.mxu1 %v594_v0 }
  0x45   :  { %442 = vmatpush3.msra.mxu0 %v87_v31  ;;  %477 = vmatpush3.msra.mxu1 %v70_v32 }
  0x46   :  { %444 = vmatmul.mubr.f32.vlgmr.msra.gmra.mxu0 %v86_v33  ;;  %479 = vmatmul.mubr.f32.vlgmr.msra.gmra.mxu1 %v69_v34 }
  0x47   :  { %481 = vmatprep.subr.mxu0 %v594_v0  ;;  %513 = vmatprep.mubr.msk.f32.mxu0 %vm595_vm0, %v594_v0 }
  0x48   :  { %482 = vmatpush3.msra.mxu0 %v269_v35 }
  0x49   :  { %483 = vmatprep.subr.mxu0 %v594_v0 }
  0x4a   :  { %484 = vmatpush3.msra.mxu0 %v268_v36 }
  0x4b   :  { %485 = vmatprep.subr.mxu0 %v594_v0 }
  0x4c   :  { %486 = vmatpush3.msra.mxu0 %v267_v37 }
  0x4d   :  { %487 = vmatprep.subr.mxu0 %v594_v0 }
  0x4e   :  { %488 = vmatpush3.msra.mxu0 %v266_v38 }
  0x4f   :  { %489 = vmatprep.subr.mxu0 %v594_v0 }
  0x50   :  { %490 = vmatpush3.msra.mxu0 %v265_v39 }
  0x51   :  { %491 = vmatprep.subr.mxu0 %v594_v0 }
  0x52   :  { %492 = vmatpush3.msra.mxu0 %v264_v40 }
  0x53   :  { %493 = vmatprep.subr.mxu0 %v594_v0 }
  0x54   :  { %494 = vmatpush3.msra.mxu0 %v263_v41 }
  0x55   :  { %495 = vmatprep.subr.mxu0 %v594_v0 }
  0x56   :  { %496 = vmatpush3.msra.mxu0 %v262_v42 }
  0x57   :  { %497 = vmatprep.subr.mxu0 %v594_v0 }
  0x58   :  { %498 = vmatpush3.msra.mxu0 %v261_v43 }
  0x59   :  { %499 = vmatprep.subr.mxu0 %v594_v0 }
  0x5a   :  { %500 = vmatpush3.msra.mxu0 %v260_v44 }
  0x5b   :  { %501 = vmatprep.subr.mxu0 %v594_v0 }
  0x5c   :  { %502 = vmatpush3.msra.mxu0 %v259_v45 }
  0x5d   :  { %503 = vmatprep.subr.mxu0 %v594_v0 }
  0x5e   :  { %504 = vmatpush3.msra.mxu0 %v258_v46 }
  0x5f   :  { %505 = vmatprep.subr.mxu0 %v594_v0 }
  0x60   :  { %506 = vmatpush3.msra.mxu0 %v257_v47 }
  0x61   :  { %507 = vmatprep.subr.mxu0 %v594_v0 }
  0x62   :  { %508 = vmatpush3.msra.mxu0 %v256_v48 }
  0x63   :  { %509 = vmatprep.subr.mxu0 %v594_v0 }
  0x64   :  { %510 = vmatpush3.msra.mxu0 %v255_v49 }
  0x65   :  { %511 = vmatprep.subr.mxu0 %v594_v0 }
  0x66   :  { %512 = vmatpush3.msra.mxu0 %v254_v50 }
 0x106   :  { %v169_v51 = vpop.f32.mrf.mxu0  ;;  %v239_v52 = vpop.f32.mrf.mxu1 }
 0x107   :  { %v240_v54 = vadd.f32 %v239_v52, %v169_v51 }
 0x108   :  { %v445_v55 = vpop.f32.mrf.mxu0  ;;  %v480_v56 = vpop.f32.mrf.mxu1 }
 0x109   :  { %v250_v57 = vadd.f32 %v358_v53, %v240_v54 }
 0x10b   :  { %523 = vtanh.f32 %v250_v57 }
 0x118   :  { %v524_v58 = vpop.eup %523 }
 0x119   :  { %252 = vst [vmem:[%s729_s7] sm:$0xff] %v524_v58  ;;  %514 = vmatmul.mubr.f32.vlgmr.msra.gmra.mxu0 %v524_v58 }
 0x1d9   :  { %v343_v60 = vpop.f32.mrf.mxu0 }
 0x1da   :  { %v344_v61 = vadd.f32 %v359_v59, %v343_v60 }
 0x1db   :  { %v515_v62 = vpop.f32.mrf.mxu0 }
 0x1dc   :  { %347 = vst [vmem:[%s730_s8] sm:$0xff] %v344_v61 }
 0x1dd   :  { %356 = vsyncpa [#allocation3], 1 }
 0x1de   :  { %357 = vsyncpa [#allocation5], 1 }

</bundles_post_ra>
